<compile_context>
chip_gen: v7x
topology: tpu7x:2x2x1
jax: 0.10.0
libtpu: 0.0.40
codegen_flags: <defaults>
</compile_context>

<pallas_src>
import math

import jax
import jax.numpy as jnp
from jax.experimental import pallas as pl
from jax.experimental.pallas import tpu as pltpu

EPS = 1e-5
_P1_BLOCK_BYTES = 4 * 1024 * 1024     # pass-1 per-block DMA target
_P2_BLOCK_BYTES = 3 * 1024 * 1024     # pass-2 per-block target (v7x-safe)
_VMEM_CAP = 32 * 1024 * 1024          # never ask for more than this (64 MiB on v7x)


def _divisors(n):
    ds = set()
    i = 1
    while i * i <= n:
        if n % i == 0:
            ds.add(i)
            ds.add(n // i)
        i += 1
    return sorted(ds)


def _vmem_limit(active_block_bytes):
    """Double-buffered big blocks + generous slack, capped for v7x."""
    return int(min(max(active_block_bytes + (8 << 20), 16 << 20), _VMEM_CAP))


# --------------------------------------------------------------------------------------
# Pass 1: per-channel sum / shifted sum-of-squares of the BN half over (N, H*W).
# --------------------------------------------------------------------------------------
def _make_bn_stats_kernel(inv_hwb):
    def kernel(x_ref, s1_ref, s2_ref):
        first = jnp.logical_and(pl.program_id(1) == 0, pl.program_id(2) == 0)

        @pl.when(first)
        def _():
            s1_ref[...] = jnp.zeros_like(s1_ref)
            s2_ref[...] = jnp.zeros_like(s2_ref)

        x = x_ref[...].astype(jnp.float32)                 # (1, cb1, hwb)
        s1 = jnp.sum(x, axis=-1, keepdims=True)            # (1, cb1, 1)
        m = s1 * inv_hwb                                    # block-local per-channel mean
        xc = x - m
        ss = jnp.sum(xc * xc, axis=-1, keepdims=True)       # centered SS within block
        s1_ref[...] += s1
        # Shifted sum-of-squares: sum_b [ SS_b + n_b * m_b^2 ]  (== sum x^2 exactly,
        # but the large-magnitude part cancels inside the block instead of globally).
        s2_ref[...] += ss + m * s1

    return kernel


# --------------------------------------------------------------------------------------
# Pass 2: fused IN stats + normalize + affine for all channels (one read, one write).
# --------------------------------------------------------------------------------------
def _make_normalize_kernel(inv_hw, half, cb2):
    def kernel(x_ref, scale_ref, shift_ref, mask_ref, o_ref, es_ref, eh_ref):
        c = pl.program_id(0)                                # channel-block index
        x = x_ref[...].astype(jnp.float32)                  # (1, cb2, HW)
        has_in = (c * cb2) < half                           # block touches IN channels?

        @pl.when(has_in)
        def _():
            # Two-pass per-(n, c) stats on the VMEM-resident block (numerically safe).
            mean = jnp.sum(x, axis=-1, keepdims=True) * inv_hw
            xc = x - mean
            var = jnp.sum(xc * xc, axis=-1, keepdims=True) * inv_hw
            inv = jax.lax.rsqrt(var + EPS)
            mask = mask_ref[...]                            # 1.0 -> IN, 0.0 -> BN
            inv_sel = mask * inv + (1.0 - mask)
            es = scale_ref[...] * inv_sel                   # IN: gamma*inv | BN: folded
            es_ref[...] = es
            eh_ref[...] = shift_ref[...] - mask * mean * es

        @pl.when(jnp.logical_not(has_in))
        def _():                                            # pure BN block: skip stats
            es_ref[...] = scale_ref[...]
            eh_ref[...] = shift_ref[...]

        o_ref[...] = (x * es_ref[...] + eh_ref[...]).astype(o_ref.dtype)

    return kernel


def dubin_forward(x, in_weight, in_bias, bn_weights, bn_biases, bn_branch=0):
    """DuBIN forward. x: (N, C, H, W), any float dtype (stats in f32, output in x.dtype)."""
    N, C, H, W = x.shape
    half = int(C * 0.5)
    c_bn = C - half
    HW = H * W
    f32 = jnp.float32
    itemsize = x.dtype.itemsize

    xf = x.reshape(N, C, HW)                                 # free for contiguous NCHW

    bn_gamma = jnp.asarray(bn_weights)[bn_branch].astype(f32)
    bn_beta = jnp.asarray(bn_biases)[bn_branch].astype(f32)

    # ----- Pass 1 tiling: 8-aligned channel blocks inside the BN half ------------------
    g = math.gcd(half, c_bn)
    cands = [d for d in _divisors(g) if d % 8 == 0] if g > 0 else []
    if cands:
        pool = [d for d in cands if (c_bn // d) >= 2] or cands     # megacore: >=2 blocks
        fitting = [d for d in pool if d * HW * itemsize <= _P1_BLOCK_BYTES]
        cb1 = max(fitting) if fitting else min(pool)
        c0_blk = half // cb1              # first BN channel, in channel-block units
        n_cb1 = c_bn // cb1
        reads_full_c = False
    else:
        # Tiny / unaligned channel counts: read all channels, discard IN stats after.
        cb1, c0_blk, n_cb1, reads_full_c = C, 0, 1, True

    if cb1 * HW * itemsize <= _P1_BLOCK_BYTES:
        hwb = HW
    else:
        hw_c = [d for d in _divisors(HW)
                if d % 128 == 0 and cb1 * d * itemsize <= _P1_BLOCK_BYTES]
        hwb = max(hw_c) if hw_c else HW
    n_hw1 = HW // hwb

    s_shape = jax.ShapeDtypeStruct((n_cb1, cb1, 1), f32)
    s1, s2 = pl.pallas_call(
        _make_bn_stats_kernel(1.0 / float(hwb)),
        grid=(n_cb1, N, n_hw1),
        in_specs=[pl.BlockSpec((1, cb1, hwb),
                               lambda cb, n, h: (n, c0_blk + cb, h))],
        out_specs=(pl.BlockSpec((1, cb1, 1), lambda cb, n, h: (cb, 0, 0)),
                   pl.BlockSpec((1, cb1, 1), lambda cb, n, h: (cb, 0, 0))),
        out_shape=(s_shape, s_shape),
        compiler_params=pltpu.CompilerParams(
            dimension_semantics=("parallel", "arbitrary", "arbitrary"),
            vmem_limit_bytes=_vmem_limit(2 * cb1 * hwb * itemsize)),
    )(xf)

    s1 = s1.reshape(-1)
    s2 = s2.reshape(-1)
    if reads_full_c:
        s1 = s1[half:]
        s2 = s2[half:]

    # Tiny per-channel glue (O(C) work): fold BN stats + affine into scale/shift.
    count = float(N * HW)
    bn_mean = s1 / count
    bn_var = jnp.maximum(s2 / count - bn_mean * bn_mean, 0.0)
    bn_scale = bn_gamma * jax.lax.rsqrt(bn_var + EPS)
    bn_shift = bn_beta - bn_mean * bn_scale

    scale_p = jnp.concatenate([jnp.asarray(in_weight).astype(f32), bn_scale]).reshape(1, C, 1)
    shift_p = jnp.concatenate([jnp.asarray(in_bias).astype(f32), bn_shift]).reshape(1, C, 1)
    mask_in = jnp.concatenate([jnp.ones((half,), f32),
                               jnp.zeros((c_bn,), f32)]).reshape(1, C, 1)

    # ----- Pass 2 tiling: 8-aligned channel blocks, preferably pure IN or pure BN ------
    c2_cands = [d for d in _divisors(C) if d % 8 == 0 and half % d == 0]
    if not c2_cands:
        c2_cands = [d for d in _divisors(C) if d % 8 == 0]
    if c2_cands:
        fit2 = [d for d in c2_cands if d * HW * itemsize <= _P2_BLOCK_BYTES]
        cb2 = max(fit2) if fit2 else min(c2_cands)
    else:
        cb2 = C                                              # full channel dim (tiny C)
    n_cb2 = C // cb2

    out = pl.pallas_call(
        _make_normalize_kernel(1.0 / float(HW), half, cb2),
        grid=(n_cb2, N),                                     # params resident over inner N
        in_specs=[
            pl.BlockSpec((1, cb2, HW), lambda c, n: (n, c, 0)),
            pl.BlockSpec((1, cb2, 1), lambda c, n: (0, c, 0)),
            pl.BlockSpec((1, cb2, 1), lambda c, n: (0, c, 0)),
            pl.BlockSpec((1, cb2, 1), lambda c, n: (0, c, 0)),
        ],
        out_specs=pl.BlockSpec((1, cb2, HW), lambda c, n: (n, c, 0)),
        out_shape=jax.ShapeDtypeStruct((N, C, HW), x.dtype),
        scratch_shapes=[pltpu.VMEM((1, cb2, 1), f32),
                        pltpu.VMEM((1, cb2, 1), f32)],
        compiler_params=pltpu.CompilerParams(
            dimension_semantics=("parallel", "parallel"),
            vmem_limit_bytes=_vmem_limit(4 * cb2 * HW * itemsize)),
    )(xf, scale_p, shift_p, mask_in)

    return out.reshape(N, C, H, W)


def dubin_reference(x, in_weight, in_bias, bn_weights, bn_biases, bn_branch=0):
    """Pure-JAX reference matching PyTorch DuBIN (training-mode BN stats)."""
    N, C, H, W = x.shape
    half = int(C * 0.5)
    xf = x.astype(jnp.float32)
    x1, x2 = xf[:, :half], xf[:, half:]

    m1 = x1.mean(axis=(2, 3), keepdims=True)
    v1 = x1.var(axis=(2, 3), keepdims=True)                       # biased
    o1 = (x1 - m1) / jnp.sqrt(v1 + EPS)
    o1 = o1 * in_weight.reshape(1, half, 1, 1) + in_bias.reshape(1, half, 1, 1)

    m2 = x2.mean(axis=(0, 2, 3), keepdims=True)
    v2 = x2.var(axis=(0, 2, 3), keepdims=True)                    # biased
    o2 = (x2 - m2) / jnp.sqrt(v2 + EPS)
    o2 = (o2 * bn_weights[bn_branch].reshape(1, -1, 1, 1)
          + bn_biases[bn_branch].reshape(1, -1, 1, 1))
    return jnp.concatenate([o1, o2], axis=1).astype(x.dtype)


if __name__ == "__main__":
    key = jax.random.PRNGKey(0)
    k_x, k_gi, k_bi, k_gb, k_bb = jax.random.split(key, 5)

    N, C, H, W = 2, 4, 16, 16
    planes = C
    half = int(planes * 0.5)
    c_bn = planes - half

    x = jax.random.normal(k_x, (N, C, H, W), dtype=jnp.float32)

    # Perturbed affine parameters so both affine paths are actually exercised.
    in_weight = 1.0 + 0.1 * jax.random.normal(k_gi, (half,), dtype=jnp.float32)
    in_bias = 0.1 * jax.random.normal(k_bi, (half,), dtype=jnp.float32)
    bn_weights = 1.0 + 0.1 * jax.random.normal(k_gb, (2, c_bn), dtype=jnp.float32)
    bn_biases = 0.1 * jax.random.normal(k_bb, (2, c_bn), dtype=jnp.float32)

    out = dubin_forward(x, in_weight, in_bias, bn_weights, bn_biases, bn_branch=0)
    out = jax.block_until_ready(out)

    ref = dubin_reference(x, in_weight, in_bias, bn_weights, bn_biases, bn_branch=0)
    assert out.shape == (N, C, H, W), out.shape
    err = float(jnp.max(jnp.abs(out.astype(jnp.float32) - ref.astype(jnp.float32))))
    assert err < 1e-4, err

    print("KERNEL_OK")
</pallas_src>

<mosaic_0001>
module attributes {stable_mosaic.version = 11 : i64} {
  func.func @kernel(%arg0: i32, %arg1: i32, %arg2: i32, %arg3: memref<1x4x256xf32, #tpu.memory_space<vmem>>, %arg4: memref<1x4x1xf32, #tpu.memory_space<vmem>>, %arg5: memref<1x4x1xf32, #tpu.memory_space<vmem>>) attributes {dimension_semantics = [#tpu.dimension_semantics<parallel>, #tpu.dimension_semantics<arbitrary>, #tpu.dimension_semantics<arbitrary>], iteration_bounds = array<i64: 1, 2, 1>, scalar_prefetch = 0 : i64, scratch_operands = 0 : i64, tpu.core_type = #tpu.core_type<tc>, window_params = [{transform_indices = @transform_0, window_bounds = array<i64: 1, 4, 256>}, {transform_indices = @transform_1, window_bounds = array<i64: 1, 4, 1>}, {transform_indices = @transform_2, window_bounds = array<i64: 1, 4, 1>}]} {
    %c0_i32 = arith.constant 0 : i32
    %0 = arith.cmpi eq, %arg1, %c0_i32 : i32
    %c0_i32_0 = arith.constant 0 : i32
    %1 = arith.cmpi eq, %arg2, %c0_i32_0 : i32
    %2 = arith.andi %0, %1 : i1
    %3 = arith.extui %2 : i1 to i32
    %c0_i32_1 = arith.constant 0 : i32
    %4 = arith.cmpi ne, %3, %c0_i32_1 : i32
    scf.if %4 {
      %cst_18 = arith.constant 0.000000e+00 : f32
      %23 = vector.broadcast %cst_18 : f32 to vector<1x4x1xf32>
      %c0_19 = arith.constant 0 : index
      %c0_20 = arith.constant 0 : index
      %c0_21 = arith.constant 0 : index
      %24 = vector.load %arg4[%c0_19, %c0_20, %c0_21] : memref<1x4x1xf32, #tpu.memory_space<vmem>>, vector<1x4x1xf32>
      tpu.vector_store %arg4[%c0_19, %c0_20, %c0_21], %23 {strides = array<i32>} : memref<1x4x1xf32, #tpu.memory_space<vmem>>, vector<1x4x1xf32>,
      %cst_22 = arith.constant 0.000000e+00 : f32
      %25 = vector.broadcast %cst_22 : f32 to vector<1x4x1xf32>
      %c0_23 = arith.constant 0 : index
      %c0_24 = arith.constant 0 : index
      %c0_25 = arith.constant 0 : index
      %26 = vector.load %arg5[%c0_23, %c0_24, %c0_25] : memref<1x4x1xf32, #tpu.memory_space<vmem>>, vector<1x4x1xf32>
      tpu.vector_store %arg5[%c0_23, %c0_24, %c0_25], %25 {strides = array<i32>} : memref<1x4x1xf32, #tpu.memory_space<vmem>>, vector<1x4x1xf32>,
    } else {
    }
    %c0 = arith.constant 0 : index
    %c0_2 = arith.constant 0 : index
    %c0_3 = arith.constant 0 : index
    %5 = vector.load %arg3[%c0, %c0_2, %c0_3] : memref<1x4x256xf32, #tpu.memory_space<vmem>>, vector<1x4x256xf32>
    %cst = arith.constant dense<0.000000e+00> : vector<1x4xf32>
    %6 = vector.multi_reduction <add>, %5, %cst [2] : vector<1x4x256xf32> to vector<1x4xf32>
    %7 = vector.shape_cast %6 : vector<1x4xf32> to vector<1x4x1xf32>
    %cst_4 = arith.constant 3.906250e-03 : f32
    %8 = vector.broadcast %cst_4 : f32 to vector<1x4x1xf32>
    %9 = arith.mulf %7, %8 : vector<1x4x1xf32>
    %10 = vector.broadcast %9 : vector<1x4x1xf32> to vector<1x4x256xf32>
    %11 = arith.subf %5, %10 : vector<1x4x256xf32>
    %12 = arith.mulf %11, %11 : vector<1x4x256xf32>
    %cst_5 = arith.constant dense<0.000000e+00> : vector<1x4xf32>
    %13 = vector.multi_reduction <add>, %12, %cst_5 [2] : vector<1x4x256xf32> to vector<1x4xf32>
    %14 = vector.shape_cast %13 : vector<1x4xf32> to vector<1x4x1xf32>
    %c0_6 = arith.constant 0 : index
    %c0_7 = arith.constant 0 : index
    %c0_8 = arith.constant 0 : index
    %15 = vector.load %arg4[%c0_6, %c0_7, %c0_8] : memref<1x4x1xf32, #tpu.memory_space<vmem>>, vector<1x4x1xf32>
    %16 = arith.addf %15, %7 : vector<1x4x1xf32>
    %c0_9 = arith.constant 0 : index
    %c0_10 = arith.constant 0 : index
    %c0_11 = arith.constant 0 : index
    %17 = vector.load %arg4[%c0_9, %c0_10, %c0_11] : memref<1x4x1xf32, #tpu.memory_space<vmem>>, vector<1x4x1xf32>
    tpu.vector_store %arg4[%c0_9, %c0_10, %c0_11], %16 {strides = array<i32>} : memref<1x4x1xf32, #tpu.memory_space<vmem>>, vector<1x4x1xf32>,
    %c0_12 = arith.constant 0 : index
    %c0_13 = arith.constant 0 : index
    %c0_14 = arith.constant 0 : index
    %18 = vector.load %arg5[%c0_12, %c0_13, %c0_14] : memref<1x4x1xf32, #tpu.memory_space<vmem>>, vector<1x4x1xf32>
    %19 = arith.mulf %9, %7 : vector<1x4x1xf32>
    %20 = arith.addf %14, %19 : vector<1x4x1xf32>
    %21 = arith.addf %18, %20 : vector<1x4x1xf32>
    %c0_15 = arith.constant 0 : index
    %c0_16 = arith.constant 0 : index
    %c0_17 = arith.constant 0 : index
    %22 = vector.load %arg5[%c0_15, %c0_16, %c0_17] : memref<1x4x1xf32, #tpu.memory_space<vmem>>, vector<1x4x1xf32>
    tpu.vector_store %arg5[%c0_15, %c0_16, %c0_17], %21 {strides = array<i32>} : memref<1x4x1xf32, #tpu.memory_space<vmem>>, vector<1x4x1xf32>,
    return
  }
  func.func @transform_0(%arg0: i32, %arg1: i32, %arg2: i32) -> (i32, i32, i32) {
    %c0_i32 = arith.constant 0 : i32
    %0 = arith.addi %c0_i32, %arg0 : i32
    %c0_i32_0 = arith.constant 0 : i32
    return %arg1, %0, %arg2 : i32, i32, i32
  }
  func.func @transform_1(%arg0: i32, %arg1: i32, %arg2: i32) -> (i32, i32, i32) {
    %c0_i32 = arith.constant 0 : i32
    %c0_i32_0 = arith.constant 0 : i32
    %c0_i32_1 = arith.constant 0 : i32
    return %arg0, %c0_i32, %c0_i32_0 : i32, i32, i32
  }
  func.func @transform_2(%arg0: i32, %arg1: i32, %arg2: i32) -> (i32, i32, i32) {
    %c0_i32 = arith.constant 0 : i32
    %c0_i32_0 = arith.constant 0 : i32
    %c0_i32_1 = arith.constant 0 : i32
    return %arg0, %c0_i32, %c0_i32_0 : i32, i32, i32
  }
}

</mosaic_0001>

<bundles_post_ra>
// kernel: tpu_custom_call.1
= control target key start
LH: loop header
LB: loop body
LE: loop exit
PB: predicated region body
PF: predicated region fallthrough
CT: control target
= control target key end

     0   :  { %8 = vsyncpa [#allocation3], 0  ;;  %s671_s0 = inlined_call_operand.hbm [shape: f32[2,4,256], index: 0, kind: input, shape index: {}]   ;;  %s672_s1 = inlined_call_operand.vmem [shape: f32[1,4,1], index: 1, kind: output, shape index: {0}]   ;;  %s673_s2 = inlined_call_operand.vmem [shape: f32[1,4,1], index: 2, kind: output, shape index: {1}]  }
   0x1   :  { %10 = vsyncpa [#allocation3 + $0x1], 0  ;;  %s526_s9 = smov 0   ;;  %s528_s10 = smov 0  }
   0x2   :  { %s530_s11 = smov 0   ;;  %s532_s12 = smov 0  }
   0x3   :  { %s534_s13 = smov 0   ;;  %s536_s14 = smov 0  }
   0x4 LB: > { %s353_s15 = sadd.s32 4294967295, %s506_s14   ;;  %s31_s16 = sadd.s32 1, %s502_s13  ;;  %s506_s14 = sphi %s536_s14, %s16_s14   ;;  %s502_s13 = sphi %s534_s13, %s683_s13   ;;  %s498_s12 = sphi %s532_s12, %s682_s12   ;;  %s494_s11 = sphi %s530_s11, %s681_s11   ;;  %s490_s10 = sphi %s528_s10, %s680_s10   ;;  %s486_s9 = sphi %s526_s9, %s679_s9  }
   0x5   : > { %p33_p0 = scmp.ge.s32.totalorder %s31_s16, 2  ;;  %s46_s17 = sadd.s32 1, %s494_s11 }
   0x6   : > { %p53_p1 = scmp.ne.s32.totalorder %s494_s11, %s490_s10  ;;  %p54_p2 = scmp.eq.s32.totalorder %s506_s14, 0 }
   0x7   : > { %s685_s16 = smov (%p33_p0, %s31_s16), 0  ;;  %p59_p4 = scmp.ne.s32.totalorder %s490_s10, %s486_s9 }
   0x8   : > { %p562_p3 = por %p54_p2, %p53_p1  ;;  %s39_s19 = ssub.s32 %s502_s13, %s685_s16 }
   0x9   : > { %p60_p5 = scmp.eq.s32.totalorder %s353_s15, 0  ;;  %p44_p6 = scmp.eq.s32.totalorder %s39_s19, 0 }
   0xa   : > { %p374_p8 = scmp.lt.s32.totalorder %s506_s14, 2  ;;  %s135_s22 = sand.u32 1, %s494_s11  }
   0xb   : > { %p569_p7 = por %p60_p5, %p59_p4  ;;  %s366_s23 = sshll.u32 %s502_s13, 7 }
   0xc   : > { %s575_s21 = scalar_select %p44_p6, %s494_s11, %s46_s17  }
   0xd   : > { %s356_s24 = sshll.u32 %s135_s22, 3  ;;  %s582_s27 = scalar_lea.hbm %s671_s0, %s366_s23 }
   0xe   : > { %s139_s28 = scalar_lea.vmem [#allocation2], %s356_s24  ;;  %p586_p9 = pnand %p374_p8, %p562_p3 }
   0xf   : > { %s151_s29 = sshll.u32 %s139_s28, 4  ;;  %s136_s3 = scalar_lea.sflag [#allocation3], %s135_s22  ;;  %s590_s29 = int_to_ptr.vmem [resolvable:$true] %s151_s29 }
  0x10   : > { %s426_s4 = scalar_lea.hbm %s582_s27, 128  ;;  %p428_p13 = pneg %p586_p9 }
  0x11   : > { %p427_p12 = scmp.ne.s32.totalorder %s582_s27, %s426_s4  ;;  %s431_s7 = scalar_lea.hbm %s671_s0, 256 }
  0x12   : > { %p432_p2 = scmp.lt.u32.totalorder %s582_s27, %s671_s0  ;;  %p433_p3 = scmp.lt.u32.totalorder %s431_s7, %s426_s4 }
  0x13   : > { %p429_p0 = pnand %p428_p13, %p427_p12  ;;  %p435_p5 = scmp.lt.u32.totalorder %s426_s4, %s582_s27 }
  0x14   : > { %p434_p4 = por %p433_p3, %p432_p2 }
  0x15   : > { %p430_p1 = pneg %p429_p0 }
  0x16   : > { %p436_p6 = por %p435_p5, %p434_p4 }
  0x18   : > { %p437_p8 = pnand %p436_p6, %p430_p1 }
  0x1a   : > { %440 = shalt.err (!%p437_p8)
}
  0x1b   : > { %s441_s15 = scalar_lea.vmem %s590_s29, 128  ;;  %s508_s17 = smov [#allocation2]  }
  0x1c   : > { %p442_p12 = scmp.ne.s32.totalorder %s590_s29, %s441_s15  ;;  %s446_s18 = sshll.u32 %s508_s17, 4  ;;  %s447_s18 = int_to_ptr.vmem [resolvable:$false] %s446_s18 }
  0x1d   : > { %s448_s19 = scalar_lea.vmem %s447_s18, 256  ;;  %p449_p11 = scmp.lt.s32.totalorder %s590_s29, %s447_s18 }
  0x1e   : > { %p444_p0 = pnand %p442_p12, %p428_p13  ;;  %p450_p2 = scmp.lt.s32.totalorder %s448_s19, %s441_s15 }
  0x20   : > { %p445_p10 = pneg %p444_p0  ;;  %p451_p3 = por %p450_p2, %p449_p11 }
  0x22   : > { %p452_p4 = pnand %p451_p3, %p445_p10 }
  0x24   : > { %455 = shalt.err (!%p452_p4)
}
  0x25   : > { %373 = dma.hbm_to_vmem [thread:$0]  (!%p586_p9), %s582_s27, 128, %s590_s29, %s136_s3  }
  0x26   : > { %p677_p1 = scmp.lt.s32.totalorder %s506_s14, 3  ;;  %p678_p5 = scmp.ge.s32.totalorder %s506_s14, 1 }
  0x28   : > { %p157_p13 = pnand %p678_p5, %p677_p1 }
  0x29   : > { %s162_s22 = sand.u32 (!%p157_p13), 1, %s490_s10  }
  0x2a   : > { %160 = sbr.rel (%p157_p13) target bundleno = 367 (0x16f), region = 24  ;;  %s360_s23 = sshll.u32 (!%p157_p13), %s162_s22, 3 }
  0x2b   : > { %s163_s24 = scalar_lea.sflag (!%p157_p13), [#allocation3], %s162_s22  ;;  %s166_s25 = scalar_lea.vmem (!%p157_p13), [#allocation2], %s360_s23 }
  0x31   : > { %481 = dma.done.wait (%p569_p7), %s163_s24, 128  }
  0x32   : > { %483 = vsyncadd (%p569_p7), %s163_s24, 4294967168  ;;  %p199_p10 = scmp.eq.s32.totalorder %s498_s12, 0 }
  0x33   : > { %vm205_vm0 = vcmask (%p199_p10), 3072   ;;  %v509_v0 = vmov (%p199_p10), 0.0  }
  0x34   : > { %204 = sbr.rel (!%p199_p10) target bundleno = 59 (0x3b), region = 32  ;;  %206 = vst.msk [vmem:[%s672_s1] sm:$0xf] (%p199_p10), %vm205_vm0, %v509_v0  ;;  %207 = vst.msk [vmem:[%s673_s2] sm:$0xf] (%p199_p10), %vm205_vm0, %v509_v0 }
  0x3b PF: > { %v208_v1 = vld [vmem:[%s166_s25] sm:$0xff]  ;;  %vm212_vm1 = vcmask 1043456   ;;  %v510_v6 = vmov 839922192   ;;  %v223_v8 = vlaneseq  ;;  %vm240_vm2 = vcmask 3072  }
  0x3c   : > { %v210_v2 = vcombine.high %v208_v1, %v208_v1  ;;  %v213_v3 = vsel %vm212_vm1, %v208_v1, 0.0  ;;  %v221_v7 = vunpack.c.l.s4 %v510_v6  ;;  %v238_v11 = vld [vmem:[%s672_s1] sm:$0xf] }
  0x3d   : > { %v224_v10 = vshrl.u32 %v223_v8, 7  ;;  %v242_v24 = vld [vmem:[%s673_s2] sm:$0xf] }
  0x3e   : > { %v214_v4 = vsel %vm212_vm1, %v210_v2, 0.0  ;;  %v222_v9 = vunpack.c.0.s8 %v221_v7 }
  0x3f   : > { %v215_v5 = vadd.f32 %v214_v4, %v213_v3 }
  0x40   : > { %v225_v12 = vsub.s32 %v222_v9, %v224_v10 }
  0x41   : > { %216 = vadd.xlane.f32.xlu0 %v215_v5 }
  0xce   : > { %v217_v13 = vpop.xlane.xlu0 %216 }
  0xcf   : > { %v218_v14 = vmul.f32 0.00390625, %v217_v13  ;;  %v239_v15 = vadd.f32 %v238_v11, %v217_v13 }
  0xd1   : > { %v226_v16 = vrot.slane %v218_v14, %v225_v12  ;;  %241 = vst.msk [vmem:[%s672_s1] sm:$0xf] %vm240_vm2, %v239_v15  ;;  %v243_v23 = vmul.f32 %v218_v14, %v217_v13 }
  0xd3   : > { %v228_v17 = vsub.f32 %v208_v1, %v226_v16 }
  0xd5   : > { %v229_v18 = vmul.f32 %v228_v17, %v228_v17 }
  0xd7   : > { %v231_v19 = vcombine.high %v229_v18, %v229_v18  ;;  %v233_v20 = vsel %vm212_vm1, %v229_v18, 0.0 }
  0xd9   : > { %v234_v21 = vsel %vm212_vm1, %v231_v19, 0.0 }
  0xda   : > { %v235_v22 = vadd.f32 %v234_v21, %v233_v20 }
  0xdc   : > { %236 = vadd.xlane.f32.xlu0 %v235_v22 }
 0x169   : > { %v237_v25 = vpop.xlane.xlu0 %236 }
 0x16a   : > { %v244_v26 = vadd.f32 %v243_v23, %v237_v25 }
 0x16c   : > { %v245_v27 = vadd.f32 %v244_v26, %v242_v24 }
 0x16e   : > { %246 = vst.msk [vmem:[%s673_s2] sm:$0xf] %vm240_vm2, %v245_v27 }
 0x16f PF: > { %s16_s14 = sadd.s32 1, %s506_s14   ;;  %s679_s9 = smov %s490_s10 }
 0x170   : > { %p13_p7 = scmp.ge.s32.totalorder %s16_s14, 4   ;;  %s680_s10 = smov %s494_s11 }
 0x171   : > { %s681_s11 = smov %s575_s21  ;;  %s682_s12 = smov %s502_s13 }
 0x172   : > { %s683_s13 = smov %s685_s16  ;;  %15 = sbr.rel (!%p13_p7) target bundleno = 4 (0x4), region = 80 }
 0x179   :  { %280 = vsyncpa [#allocation3], 1 }
 0x17a   :  { %282 = vsyncpa [#allocation3 + $0x1], 1 }

</bundles_post_ra>
